<compile_context>
chip_gen: v6e
topology: v6e:2x2x1
jax: 0.10.0
libtpu: 0.0.40
codegen_flags: <defaults>
</compile_context>

<pallas_src>
import functools

import jax
import jax.numpy as jnp
from jax.experimental import pallas as pl
from jax.experimental.pallas import tpu as pltpu

_LANE = 128
_SUBLANE = 8
_NEG_SLOPE = 0.01  # PyTorch LeakyReLU default negative_slope


def _round_up(x, m):
    return ((x + m - 1) // m) * m


def _decoder_kernel(z_ref, w1_ref, b1_ref, w2_ref, b2_ref, out_ref, h_ref):
    # h depends only on the batch tile -> compute once (n == 0) and reuse it
    # for every W2 column tile via the persistent VMEM scratch.
    @pl.when(pl.program_id(1) == 0)
    def _():
        h = jnp.dot(z_ref[...], w1_ref[...], preferred_element_type=jnp.float32)
        h = h + b1_ref[...].astype(jnp.float32)        # bias add in f32 (VPU)
        h = jnp.where(h >= 0, h, _NEG_SLOPE * h)       # LeakyReLU in f32
        # Dropout (eval mode) = identity.
        h_ref[...] = h.astype(h_ref.dtype)             # stored in matmul dtype

    y = jnp.dot(h_ref[...], w2_ref[...], preferred_element_type=jnp.float32)
    y = y + b2_ref[...].astype(jnp.float32)
    out_ref[...] = y.astype(out_ref.dtype)


def _pad2d(x, rows, cols):
    pr, pc = rows - x.shape[0], cols - x.shape[1]
    if pr or pc:
        x = jnp.pad(x, ((0, pr), (0, pc)))
    return x


def _vmem_budget_and_limit():
    """Per-generation VMEM planning budget and Mosaic scoped-VMEM limit."""
    cap = 64 << 20  # conservative fallback = v7x per-TC VMEM
    try:
        info = pltpu.get_tpu_info()
        cap = int(getattr(info, "vmem_capacity_bytes", cap))
    except Exception:
        pass
    budget = (cap * 3) // 4                              # ~96 MiB v5e/v6e, ~48 MiB v7x
    limit = min(budget + (8 << 20), cap - (8 << 20))     # headroom, never past physical
    return budget, max(limit, budget)


def _mxu_n_multiple():
    # 256-wide column tiles saturate the v6e/v7x MXU; 128 is right for v5e.
    try:
        kind = jax.devices()[0].device_kind.lower()
        if any(t in kind for t in ("v6", "v7", "7x")):
            return 256
    except Exception:
        pass
    return 128


def _choose_tiles(B, Hp, O, w_item, out_item, budget, n_mult):
    """Return (TB, TN, Op_padded), or None if even the smallest tiles don't fit."""
    Op = _round_up(O, _LANE)

    # N-tile candidates: full width first (single fused shot), then shrinking
    # multiples of the MXU column width.
    tn_cands = [Op]
    t = Op
    while t % 2 == 0 and (t // 2) >= n_mult and (t // 2) % n_mult == 0:
        t //= 2
        tn_cands.append(t)
    for extra in (n_mult, _LANE):
        if Op % extra == 0 and extra < tn_cands[-1]:
            tn_cands.append(extra)

    max_tb = _round_up(B, _SUBLANE)
    tb_cands = []
    for c in (1024, 512, 256, 128, 64, 32, 16, 8):
        c = min(c, max_tb)
        if c not in tb_cands:
            tb_cands.append(c)

    def fits(tb, tn):
        # Count 2x for every pipelined input (double-buffered even with a
        # constant index_map).
        weights = 2 * Hp * Op * w_item + 2 * Op * 4          # W1 + b1 (f32)
        weights += 2 * Op * tn * w_item + 2 * tn * 4         # W2 tile + b2 tile (f32)
        acts = 2 * tb * Hp * w_item + 2 * tb * tn * out_item  # z in / out
        scratch = tb * Op * w_item                            # persistent h scratch
        temps = 2 * tb * (Op + tn) * 4                        # f32 matmul results etc.
        return weights + acts + scratch + temps <= budget

    waste_cap = max(B // 8, _SUBLANE - 1)  # tolerate <=~12.5% padded-batch waste
    best = None
    for tn in tn_cands:
        fitting = [tb for tb in tb_cands if fits(tb, tn)]
        if not fitting:
            continue
        ok = [tb for tb in fitting if _round_up(B, tb) - B <= waste_cap]
        tb = ok[0] if ok else fitting[-1]
        if best is None:
            best = (tb, tn)
        if tb >= min(128, max_tb):      # decent batch tile -> take widest N tile
            return tb, tn, Op
    if best is not None:
        return best[0], best[1], Op
    return None


@functools.partial(jax.jit, static_argnames=("matmul_dtype",))
def base_decoder_forward(z, w1_t, b1, w2_t, b2, *, matmul_dtype=jnp.bfloat16):
    """z: [B, H]; w1_t: [H, O]; b1: [O]/[1,O]; w2_t: [O, O]; b2: [O]/[1,O] -> [B, O]."""
    out_dtype = z.dtype
    B, H = z.shape
    O = w1_t.shape[1]
    # Biases stay f32: they are added post-MXU on the VPU.
    b1 = b1.reshape(1, O).astype(jnp.float32)
    b2 = b2.reshape(1, O).astype(jnp.float32)

    mm_dtype = jnp.dtype(matmul_dtype if matmul_dtype is not None else z.dtype)
    z_mm = z.astype(mm_dtype)
    w1_mm = w1_t.astype(mm_dtype)
    w2_mm = w2_t.astype(mm_dtype)

    Hp = _round_up(H, _LANE)
    budget, vmem_limit = _vmem_budget_and_limit()
    tiles = _choose_tiles(B, Hp, O, mm_dtype.itemsize,
                          jnp.dtype(out_dtype).itemsize, budget, _mxu_n_multiple())

    if tiles is None:
        # Weights exceed the VMEM budget even at the smallest tiles: plain XLA path.
        # TODO(synk): fully-tiled (K-split) two-kernel Pallas path for huge H/O.
        h = jnp.dot(z_mm, w1_mm, preferred_element_type=jnp.float32) + b1
        h = jnp.where(h >= 0, h, _NEG_SLOPE * h).astype(mm_dtype)
        y = jnp.dot(h, w2_mm, preferred_element_type=jnp.float32) + b2
        return y.astype(out_dtype)

    TB, TN, Op = tiles
    Bp = _round_up(B, TB)

    # Zero padding is exact (contributes 0 to the dots); sliced off below.
    z_p = _pad2d(z_mm, Bp, Hp)
    w1_p = _pad2d(w1_mm, Hp, Op)
    w2_p = _pad2d(w2_mm, Op, Op)
    b1_p = _pad2d(b1, 1, Op)
    b2_p = _pad2d(b2, 1, Op)

    flops = 2 * Bp * Hp * Op + 2 * Bp * Op * Op
    bytes_accessed = (z_p.size * mm_dtype.itemsize
                      + (w1_p.size + w2_p.size) * mm_dtype.itemsize
                      + (b1_p.size + b2_p.size) * 4
                      + Bp * Op * jnp.dtype(out_dtype).itemsize)

    out_p = pl.pallas_call(
        _decoder_kernel,
        out_shape=jax.ShapeDtypeStruct((Bp, Op), out_dtype),
        grid=(Bp // TB, Op // TN),
        in_specs=[
            pl.BlockSpec((TB, Hp), lambda i, n: (i, 0)),   # z streams over batch tiles
            pl.BlockSpec((Hp, Op), lambda i, n: (0, 0)),   # W1 VMEM-resident
            pl.BlockSpec((1, Op), lambda i, n: (0, 0)),    # b1 VMEM-resident (f32)
            pl.BlockSpec((Op, TN), lambda i, n: (0, n)),   # W2 column tiles
            pl.BlockSpec((1, TN), lambda i, n: (0, n)),    # b2 column tiles (f32)
        ],
        out_specs=pl.BlockSpec((TB, TN), lambda i, n: (i, n)),
        scratch_shapes=[pltpu.VMEM((TB, Op), mm_dtype)],   # persistent h activation
        compiler_params=pltpu.CompilerParams(
            # Batch tiles are independent ("parallel" -> megacore-shardable);
            # n axis reuses the h scratch -> "arbitrary".
            # TODO(synk): verify the 2-TC split on v7x; use pltpu.CORE_PARALLEL if not.
            dimension_semantics=("parallel", "arbitrary"),
            vmem_limit_bytes=int(vmem_limit),
        ),
        cost_estimate=pl.CostEstimate(
            flops=int(flops), transcendentals=0, bytes_accessed=int(bytes_accessed)),
    )(z_p, w1_p, b1_p, w2_p, b2_p)

    return out_p[:B, :O]


def init_params(key, hidden_size, output_size, dtype=jnp.float32):
    """Deterministic parameter init (uniform, mimicking PyTorch Linear bounds)."""
    k1, k2, k3, k4 = jax.random.split(key, 4)
    bound1 = 1.0 / jnp.sqrt(hidden_size)
    bound2 = 1.0 / jnp.sqrt(output_size)
    # PyTorch stores Linear weight as [out, in]; we keep the transposed [in, out] layout.
    w1_t = jax.random.uniform(k1, (hidden_size, output_size), dtype, -bound1, bound1)
    b1 = jax.random.uniform(k2, (1, output_size), dtype, -bound1, bound1)
    w2_t = jax.random.uniform(k3, (output_size, output_size), dtype, -bound2, bound2)
    b2 = jax.random.uniform(k4, (1, output_size), dtype, -bound2, bound2)
    return w1_t, b1, w2_t, b2


def reference_forward(z, w1_t, b1, w2_t, b2):
    h = z @ w1_t + b1
    h = jnp.where(h >= 0, h, _NEG_SLOPE * h)
    return h @ w2_t + b2


if __name__ == "__main__":
    key = jax.random.PRNGKey(0)
    kz, kp = jax.random.split(key)

    batch = 8
    hidden_size = 32
    output_size = 16

    z = jax.random.normal(kz, (batch, hidden_size), dtype=jnp.float32)
    w1_t, b1, w2_t, b2 = init_params(kp, hidden_size, output_size)
    ref = reference_forward(z, w1_t, b1, w2_t, b2)

    # Exact f32 MXU path (tight tolerance).
    out_f32 = jax.block_until_ready(
        base_decoder_forward(z, w1_t, b1, w2_t, b2, matmul_dtype=jnp.float32))
    assert out_f32.shape == (batch, output_size)
    assert jnp.allclose(out_f32, ref, atol=1e-5, rtol=1e-5)

    # Default bf16 MXU-input path (f32 accumulation) -> looser tolerance.
    out_bf16 = jax.block_until_ready(base_decoder_forward(z, w1_t, b1, w2_t, b2))
    assert out_bf16.shape == (batch, output_size)
    assert jnp.allclose(out_bf16, ref, atol=3e-2, rtol=3e-2)

    print("KERNEL_OK")
</pallas_src>

<mosaic_0001>
module attributes {stable_mosaic.version = 11 : i64} {
  func.func @_decoder_kernel(%arg0: i32, %arg1: i32, %arg2: memref<8x128xf32, #tpu.memory_space<vmem>>, %arg3: memref<128x128xf32, #tpu.memory_space<vmem>>, %arg4: memref<1x128xf32, #tpu.memory_space<vmem>>, %arg5: memref<128x128xf32, #tpu.memory_space<vmem>>, %arg6: memref<1x128xf32, #tpu.memory_space<vmem>>, %arg7: memref<8x128xf32, #tpu.memory_space<vmem>>, %arg8: memref<8x128xf32, #tpu.memory_space<vmem>>) attributes {dimension_semantics = [#tpu.dimension_semantics<parallel>, #tpu.dimension_semantics<arbitrary>], iteration_bounds = array<i64: 1, 1>, scalar_prefetch = 0 : i64, scratch_operands = 1 : i64, tpu.core_type = #tpu.core_type<tc>, window_params = [{transform_indices = @transform_0, window_bounds = array<i64: 8, 128>}, {pipeline_mode = #tpu.pipeline_mode<synchronous>, transform_indices = @transform_1, window_bounds = array<i64: 128, 128>}, {pipeline_mode = #tpu.pipeline_mode<synchronous>, transform_indices = @transform_2, window_bounds = array<i64: 1, 128>}, {transform_indices = @transform_3, window_bounds = array<i64: 128, 128>}, {transform_indices = @transform_4, window_bounds = array<i64: 1, 128>}, {transform_indices = @transform_5, window_bounds = array<i64: 8, 128>}]} {
    %c0_i32 = arith.constant 0 : i32
    %0 = arith.cmpi eq, %arg1, %c0_i32 : i32
    %1 = arith.extui %0 : i1 to i32
    %c0_i32_0 = arith.constant 0 : i32
    %2 = arith.cmpi ne, %1, %c0_i32_0 : i32
    scf.if %2 {
      %c0_8 = arith.constant 0 : index
      %c0_9 = arith.constant 0 : index
      %10 = vector.load %arg2[%c0_8, %c0_9] : memref<8x128xf32, #tpu.memory_space<vmem>>, vector<8x128xf32>
      %c0_10 = arith.constant 0 : index
      %c0_11 = arith.constant 0 : index
      %11 = vector.load %arg3[%c0_10, %c0_11] : memref<128x128xf32, #tpu.memory_space<vmem>>, vector<128x128xf32>
      %cst_12 = arith.constant dense<0.000000e+00> : vector<8x128xf32>
      %12 = tpu.matmul %10, %11, %cst_12 {dimension_numbers = #tpu.dot_dimension_numbers<[1], [0], [0], [1], [0, 0, 1, 1], [], []>} : vector<8x128xf32>, vector<128x128xf32>, vector<8x128xf32> -> vector<8x128xf32>
      %c0_13 = arith.constant 0 : index
      %c0_14 = arith.constant 0 : index
      %13 = vector.load %arg4[%c0_13, %c0_14] : memref<1x128xf32, #tpu.memory_space<vmem>>, vector<1x128xf32>
      %14 = vector.broadcast %13 : vector<1x128xf32> to vector<8x128xf32>
      %15 = arith.addf %12, %14 : vector<8x128xf32>
      %cst_15 = arith.constant 0.000000e+00 : f32
      %16 = vector.broadcast %cst_15 : f32 to vector<8x128xf32>
      %17 = arith.cmpf oge, %15, %16 : vector<8x128xf32>
      %cst_16 = arith.constant 0.00999999977 : f32
      %18 = vector.broadcast %cst_16 : f32 to vector<8x128xf32>
      %19 = arith.mulf %18, %15 : vector<8x128xf32>
      %20 = arith.select %17, %15, %19 : vector<8x128xi1>, vector<8x128xf32>
      %c0_17 = arith.constant 0 : index
      %c0_18 = arith.constant 0 : index
      %21 = vector.load %arg8[%c0_17, %c0_18] : memref<8x128xf32, #tpu.memory_space<vmem>>, vector<8x128xf32>
      tpu.vector_store %arg8[%c0_17, %c0_18], %20 {strides = array<i32>} : memref<8x128xf32, #tpu.memory_space<vmem>>, vector<8x128xf32>,
    } else {
    }
    %c0 = arith.constant 0 : index
    %c0_1 = arith.constant 0 : index
    %3 = vector.load %arg8[%c0, %c0_1] : memref<8x128xf32, #tpu.memory_space<vmem>>, vector<8x128xf32>
    %c0_2 = arith.constant 0 : index
    %c0_3 = arith.constant 0 : index
    %4 = vector.load %arg5[%c0_2, %c0_3] : memref<128x128xf32, #tpu.memory_space<vmem>>, vector<128x128xf32>
    %cst = arith.constant dense<0.000000e+00> : vector<8x128xf32>
    %5 = tpu.matmul %3, %4, %cst {dimension_numbers = #tpu.dot_dimension_numbers<[1], [0], [0], [1], [0, 0, 1, 1], [], []>} : vector<8x128xf32>, vector<128x128xf32>, vector<8x128xf32> -> vector<8x128xf32>
    %c0_4 = arith.constant 0 : index
    %c0_5 = arith.constant 0 : index
    %6 = vector.load %arg6[%c0_4, %c0_5] : memref<1x128xf32, #tpu.memory_space<vmem>>, vector<1x128xf32>
    %7 = vector.broadcast %6 : vector<1x128xf32> to vector<8x128xf32>
    %8 = arith.addf %5, %7 : vector<8x128xf32>
    %c0_6 = arith.constant 0 : index
    %c0_7 = arith.constant 0 : index
    %9 = vector.load %arg7[%c0_6, %c0_7] : memref<8x128xf32, #tpu.memory_space<vmem>>, vector<8x128xf32>
    tpu.vector_store %arg7[%c0_6, %c0_7], %8 {strides = array<i32>} : memref<8x128xf32, #tpu.memory_space<vmem>>, vector<8x128xf32>,
    return
  }
  func.func @transform_0(%arg0: i32, %arg1: i32) -> (i32, i32) {
    %c0_i32 = arith.constant 0 : i32
    %c0_i32_0 = arith.constant 0 : i32
    return %arg0, %c0_i32 : i32, i32
  }
  func.func @transform_1(%arg0: i32, %arg1: i32) -> (i32, i32) {
    %c0_i32 = arith.constant 0 : i32
    %c0_i32_0 = arith.constant 0 : i32
    %c0_i32_1 = arith.constant 0 : i32
    return %c0_i32, %c0_i32_0 : i32, i32
  }
  func.func @transform_2(%arg0: i32, %arg1: i32) -> (i32, i32) {
    %c0_i32 = arith.constant 0 : i32
    %c0_i32_0 = arith.constant 0 : i32
    %c0_i32_1 = arith.constant 0 : i32
    return %c0_i32, %c0_i32_0 : i32, i32
  }
  func.func @transform_3(%arg0: i32, %arg1: i32) -> (i32, i32) {
    %c0_i32 = arith.constant 0 : i32
    %c0_i32_0 = arith.constant 0 : i32
    return %c0_i32, %arg1 : i32, i32
  }
  func.func @transform_4(%arg0: i32, %arg1: i32) -> (i32, i32) {
    %c0_i32 = arith.constant 0 : i32
    %c0_i32_0 = arith.constant 0 : i32
    return %c0_i32, %arg1 : i32, i32
  }
  func.func @transform_5(%arg0: i32, %arg1: i32) -> (i32, i32) {
    %c0_i32 = arith.constant 0 : i32
    return %arg0, %arg1 : i32, i32
  }
}

</mosaic_0001>

<bundles_post_ra>
// kernel: base_decoder_forward.1
= control target key start
LH: loop header
LB: loop body
LE: loop exit
PB: predicated region body
PF: predicated region fallthrough
CT: control target
= control target key end

     0   :  { %v363_v1 = vmov 0.0   ;;  %vm364_vm0 = vmmov 0   ;;  %s538_s0 = inlined_call_operand.vmem [shape: f32[8,128], index: 0, kind: input, shape index: {}]   ;;  %s539_s1 = inlined_call_operand.vmem [shape: f32[128,128], index: 1, kind: input, shape index: {}]   ;;  %s540_s2 = inlined_call_operand.vmem [shape: f32[1,128], index: 2, kind: input, shape index: {}]   ;;  %s541_s3 = inlined_call_operand.vmem [shape: f32[128,128], index: 3, kind: input, shape index: {}]   ;;  %s542_s4 = inlined_call_operand.vmem [shape: f32[1,128], index: 4, kind: input, shape index: {}]   ;;  %s543_s5 = inlined_call_operand.hbm [shape: f32[8,128], index: 5, kind: output, shape index: {}]  }
   0x1   :  { %v41_v0 = vld [vmem:[%s539_s1 + $0x78] sm:$0xff]  ;;  %268 = vmatprep.subr.mxu0 %v363_v1  ;;  %v40_v2 = vld [vmem:[%s539_s1 + $0x70] sm:$0xff]  ;;  %300 = vmatprep.mubr.msk.f32.mxu0 %vm364_vm0, %v363_v1  ;;  %v39_v3 = vld [vmem:[%s539_s1 + $0x68] sm:$0xff] }
   0x2   :  { %269 = vmatpush3.msra.mxu0 %v41_v0  ;;  %303 = vmatprep.subr.mxu1 %v363_v1  ;;  %v38_v4 = vld [vmem:[%s539_s1 + $0x60] sm:$0xff]  ;;  %v139_v5 = vld [vmem:[%s541_s3 + $0x78] sm:$0xff]  ;;  %v138_v6 = vld [vmem:[%s541_s3 + $0x70] sm:$0xff] }
   0x3   :  { %270 = vmatprep.subr.mxu0 %v363_v1  ;;  %335 = vmatprep.mubr.msk.f32.mxu1 %vm364_vm0, %v363_v1  ;;  %v37_v7 = vld [vmem:[%s539_s1 + $0x58] sm:$0xff]  ;;  %v137_v8 = vld [vmem:[%s541_s3 + $0x68] sm:$0xff]  ;;  %v36_v9 = vld [vmem:[%s539_s1 + $0x50] sm:$0xff] }
   0x4   :  { %271 = vmatpush3.msra.mxu0 %v40_v2  ;;  %304 = vmatpush3.msra.mxu1 %v139_v5  ;;  %v136_v10 = vld [vmem:[%s541_s3 + $0x60] sm:$0xff] }
   0x5   :  { %272 = vmatprep.subr.mxu0 %v363_v1  ;;  %305 = vmatprep.subr.mxu1 %v363_v1 }
   0x6   :  { %273 = vmatpush3.msra.mxu0 %v39_v3  ;;  %306 = vmatpush3.msra.mxu1 %v138_v6 }
   0x7   :  { %274 = vmatprep.subr.mxu0 %v363_v1  ;;  %307 = vmatprep.subr.mxu1 %v363_v1 }
   0x8   :  { %275 = vmatpush3.msra.mxu0 %v38_v4  ;;  %308 = vmatpush3.msra.mxu1 %v137_v8 }
   0x9   :  { %276 = vmatprep.subr.mxu0 %v363_v1 }
   0xa   :  { %277 = vmatpush3.msra.mxu0 %v37_v7 }
   0xb   :  { %10 = vsyncpa [#allocation4], 0  ;;  %278 = vmatprep.subr.mxu0 %v363_v1  ;;  %v35_v11 = vld [vmem:[%s539_s1 + $0x48] sm:$0xff]  ;;  %309 = vmatprep.subr.mxu1 %v363_v1  ;;  %v135_v12 = vld [vmem:[%s541_s3 + $0x58] sm:$0xff]  ;;  %s365_s11 = smov [#allocation3]  }
   0xc   :  { %279 = vmatpush3.msra.mxu0 %v36_v9  ;;  %310 = vmatpush3.msra.mxu1 %v136_v10  ;;  %v34_v13 = vld [vmem:[%s539_s1 + $0x40] sm:$0xff]  ;;  %v134_v14 = vld [vmem:[%s541_s3 + $0x50] sm:$0xff]  ;;  %v33_v15 = vld [vmem:[%s539_s1 + $0x38] sm:$0xff] }
   0xd   :  { %280 = vmatprep.subr.mxu0 %v363_v1  ;;  %311 = vmatprep.subr.mxu1 %v363_v1  ;;  %v133_v16 = vld [vmem:[%s541_s3 + $0x48] sm:$0xff]  ;;  %v32_v17 = vld [vmem:[%s539_s1 + $0x30] sm:$0xff]  ;;  %v132_v18 = vld [vmem:[%s541_s3 + $0x40] sm:$0xff] }
   0xe   :  { %281 = vmatpush3.msra.mxu0 %v35_v11  ;;  %312 = vmatpush3.msra.mxu1 %v135_v12  ;;  %v31_v19 = vld [vmem:[%s539_s1 + $0x28] sm:$0xff]  ;;  %v131_v20 = vld [vmem:[%s541_s3 + $0x38] sm:$0xff]  ;;  %v30_v21 = vld [vmem:[%s539_s1 + $0x20] sm:$0xff] }
   0xf   :  { %282 = vmatprep.subr.mxu0 %v363_v1  ;;  %313 = vmatprep.subr.mxu1 %v363_v1  ;;  %v130_v22 = vld [vmem:[%s541_s3 + $0x30] sm:$0xff]  ;;  %v29_v23 = vld [vmem:[%s539_s1 + $0x18] sm:$0xff]  ;;  %v129_v24 = vld [vmem:[%s541_s3 + $0x28] sm:$0xff] }
  0x10   :  { %283 = vmatpush3.msra.mxu0 %v34_v13  ;;  %314 = vmatpush3.msra.mxu1 %v134_v14  ;;  %v28_v25 = vld [vmem:[%s539_s1 + $0x10] sm:$0xff]  ;;  %v128_v26 = vld [vmem:[%s541_s3 + $0x20] sm:$0xff]  ;;  %v27_v27 = vld [vmem:[%s539_s1 + $0x8] sm:$0xff] }
  0x11   :  { %284 = vmatprep.subr.mxu0 %v363_v1  ;;  %315 = vmatprep.subr.mxu1 %v363_v1  ;;  %v127_v28 = vld [vmem:[%s541_s3 + $0x18] sm:$0xff]  ;;  %v26_v29 = vld [vmem:[%s539_s1] sm:$0xff]  ;;  %v126_v31 = vld [vmem:[%s541_s3 + $0x10] sm:$0xff] }
  0x12   :  { %285 = vmatpush3.msra.mxu0 %v33_v15  ;;  %316 = vmatpush3.msra.mxu1 %v133_v16  ;;  %v25_v30 = vld [vmem:[%s538_s0] sm:$0xff]  ;;  %v125_v32 = vld [vmem:[%s541_s3 + $0x8] sm:$0xff] }
  0x13   :  { %286 = vmatprep.subr.mxu0 %v363_v1  ;;  %317 = vmatprep.subr.mxu1 %v363_v1  ;;  %v124_v33 = vld [vmem:[%s541_s3] sm:$0xff]  ;;  %s224_s3 = sshll.u32 %s365_s11, 4  ;;  %s225_s3 = int_to_ptr.vmem [resolvable:$true] %s224_s3 }
  0x14   :  { %287 = vmatpush3.msra.mxu0 %v32_v17  ;;  %318 = vmatpush3.msra.mxu1 %v132_v18  ;;  %v232_v34 = vld [vmem:[%s540_s2] ss:$0 sm:$0xff]  ;;  %s341_s12 = scalar_lea.vmem %s225_s3, 128  ;;  %p346_p1 = scmp.lt.s32.totalorder %s225_s3, %s225_s3 }
  0x15   :  { %288 = vmatprep.subr.mxu0 %v363_v1  ;;  %319 = vmatprep.subr.mxu1 %v363_v1  ;;  %v233_v40 = vld [vmem:[%s542_s4] ss:$0 sm:$0xff]  ;;  %p342_p0 = scmp.ne.s32.totalorder %s225_s3, %s341_s12  ;;  %p347_p2 = scmp.lt.s32.totalorder %s341_s12, %s341_s12 }
  0x16   :  { %289 = vmatpush3.msra.mxu0 %v31_v19  ;;  %320 = vmatpush3.msra.mxu1 %v131_v20 }
  0x17   :  { %290 = vmatprep.subr.mxu0 %v363_v1  ;;  %321 = vmatprep.subr.mxu1 %v363_v1  ;;  %p348_p3 = por %p347_p2, %p346_p1 }
  0x18   :  { %291 = vmatpush3.msra.mxu0 %v30_v21  ;;  %322 = vmatpush3.msra.mxu1 %v130_v22 }
  0x19   :  { %292 = vmatprep.subr.mxu0 %v363_v1  ;;  %323 = vmatprep.subr.mxu1 %v363_v1  ;;  %p349_p4 = pnand %p348_p3, %p342_p0 }
  0x1a   :  { %293 = vmatpush3.msra.mxu0 %v29_v23  ;;  %324 = vmatpush3.msra.mxu1 %v129_v24 }
  0x1b   :  { %294 = vmatprep.subr.mxu0 %v363_v1  ;;  %325 = vmatprep.subr.mxu1 %v363_v1 }
  0x1c   :  { %295 = vmatpush3.msra.mxu0 %v28_v25  ;;  %326 = vmatpush3.msra.mxu1 %v128_v26 }
  0x1d   :  { %296 = vmatprep.subr.mxu0 %v363_v1  ;;  %327 = vmatprep.subr.mxu1 %v363_v1 }
  0x1e   :  { %297 = vmatpush3.msra.mxu0 %v27_v27  ;;  %328 = vmatpush3.msra.mxu1 %v127_v28 }
  0x1f   :  { %298 = vmatprep.subr.mxu0 %v363_v1  ;;  %329 = vmatprep.subr.mxu1 %v363_v1 }
  0x20   :  { %299 = vmatpush3.msra.mxu0 %v26_v29  ;;  %330 = vmatpush3.msra.mxu1 %v126_v31 }
  0x21   :  { %301 = vmatmul.mubr.f32.vlgmr.msra.gmra.mxu0 %v25_v30  ;;  %331 = vmatprep.subr.mxu1 %v363_v1 }
  0x22   :  { %332 = vmatpush3.msra.mxu1 %v125_v32 }
  0x23   :  { %333 = vmatprep.subr.mxu1 %v363_v1 }
  0x24   :  { %334 = vmatpush3.msra.mxu1 %v124_v33 }
  0xe1   :  { %v115_v35 = vpop.f32.mrf.mxu0 }
  0xe2   :  { %v116_v36 = vadd.f32 %v232_v34, %v115_v35 }
  0xe3   :  { %v302_v37 = vpop.f32.mrf.mxu0 }
  0xe4   :  { %v120_v38 = vmul.f32 0.01, %v116_v36  ;;  %vm119_vm1 = vcmp.ge.f32.partialorder %v116_v36, 0.0 }
  0xe6   :  { %v121_v39 = vsel %vm119_vm1, %v116_v36, %v120_v38 }
  0xe7   :  { %336 = vmatmul.mubr.f32.vlgmr.msra.gmra.mxu1 %v121_v39 }
 0x1a7   :  { %v213_v41 = vpop.f32.mrf.mxu1 }
 0x1a8   :  { %v214_v42 = vadd.f32 %v233_v40, %v213_v41 }
 0x1a9   :  { %v337_v43 = vpop.f32.mrf.mxu1 }
 0x1aa   :  { %217 = vst [vmem:[#allocation3] sm:$0xff] %v214_v42 }
 0x1ab   :  { %352 = shalt.err (!%p349_p4)
}
 0x1ac   :  { %227 = dma.vmem_to_hbm [thread:$0]  %s225_s3, 128, %s543_s5, [#allocation4]  }
 0x1ad   :  { %361 = dma.done.wait [#allocation4], 128  }
 0x1ae   :  { %362 = vsyncadd [#allocation4], 4294967168 }
 0x1af   :  { %231 = vsyncpa [#allocation4], 1 }

</bundles_post_ra>
